<compile_context>
chip_gen: v5e
topology: v5e:2x2
jax: 0.10.0
libtpu: 0.0.40
codegen_flags: <defaults>
</compile_context>

<pallas_src>
import jax
import jax.numpy as jnp
from jax import lax
from jax.experimental import pallas as pl
from jax.experimental.pallas import tpu as pltpu


def _dice_loss_kernel(logits_ref, labels_ref, dsc_ref):
    # (block_n, C) tile of logits, upcast for a numerically-stable softmax.
    x = logits_ref[...].astype(jnp.float32)

    m = jnp.max(x, axis=-1, keepdims=True)
    e = jnp.exp(x - m)                                          # (bn, C)
    denom = jnp.sum(e, axis=-1, keepdims=True)                  # (bn, 1)

    # Gather the un-normalized weight of the true class via a one-hot select,
    # then normalize only the (bn, 1) gathered values (never the full tile).
    labels = labels_ref[...]                                    # (bn, 1) int32
    col = lax.broadcasted_iota(jnp.int32, x.shape, 1)           # (bn, C)
    e_true = jnp.sum(jnp.where(col == labels, e, 0.0),
                     axis=-1, keepdims=True)                    # (bn, 1)
    p = e_true * pl.reciprocal(denom, approx=True)              # (bn, 1)

    # dsc_i = 1 - (1-p)*p / ((1-p)*p + 1)   (only (bn, 1) elements -> cheap)
    q = (1.0 - p) * p
    dsc_ref[...] = 1.0 - q / (q + 1.0)


def _choose_block_n(n, c, in_itemsize):
    """Rows per tile from the VMEM budget.

    Per-tile footprint ~= double-buffered input (2 * bn * C * itemsize) plus
    ~3 f32 (bn, C) temporaries (x, e, masked e).  Budget is kept well under
    the 32 MiB scoped default so the same tiling is safe on v7x (64 MiB
    physical) as well as v5e/v6e (128 MiB).
    """
    bytes_per_row = c * (2 * in_itemsize + 3 * 4)
    budget = 20 * 1024 * 1024
    bn = budget // max(bytes_per_row, 1)
    bn = int(min(bn, 2048, n))
    return max(8, (bn // 8) * 8)


def dice_loss(y_pred, y_true, *, block_n=None):
    """y_pred: (N, C) float (f32 or bf16) logits; y_true: (N,) int labels."""
    n, c = y_pred.shape
    if block_n is None:
        block_n = _choose_block_n(n, c, y_pred.dtype.itemsize)
    assert block_n % 8 == 0, "row tile must be a multiple of 8 (sublane)"

    num_tiles = -(-n // block_n)
    n_pad = num_tiles * block_n

    labels = y_true.astype(jnp.int32).reshape(n, 1)
    logits = y_pred
    if n_pad != n:
        # Pad rows up to a tile multiple; padded rows are sliced off below.
        logits = jnp.pad(logits, ((0, n_pad - n), (0, 0)))
        labels = jnp.pad(labels, ((0, n_pad - n), (0, 0)))

    # TODO(synk): for very small C (< 128) lane utilization is C/128; packing
    # k rows per vreg (N x C -> N/k x kC with a block-diagonal mask) would
    # recover compute-side throughput when not HBM-bound.
    dsc = pl.pallas_call(
        _dice_loss_kernel,
        out_shape=jax.ShapeDtypeStruct((n_pad, 1), jnp.float32),
        grid_spec=pltpu.PrefetchScalarGridSpec(
            num_scalar_prefetch=0,
            grid=(num_tiles,),
            in_specs=[
                pl.BlockSpec((block_n, c), lambda i: (i, 0)),
                pl.BlockSpec((block_n, 1), lambda i: (i, 0)),
            ],
            out_specs=pl.BlockSpec((block_n, 1), lambda i: (i, 0)),
        ),
        compiler_params=pltpu.CompilerParams(
            dimension_semantics=("parallel",),
            vmem_limit_bytes=32 * 1024 * 1024,
        ),
    )(logits, labels)

    # Mean over the real (un-padded) rows, done once in the wrapper.
    return jnp.mean(dsc[:n, 0])


def dice_loss_ref(y_pred, y_true):
    probs = jax.nn.softmax(y_pred.astype(jnp.float32), axis=1)
    p = jnp.take_along_axis(probs, y_true.astype(jnp.int32)[:, None], axis=1)
    q = (1.0 - p) * p
    return jnp.mean(1.0 - q / (q + 1.0))


if __name__ == "__main__":
    key = jax.random.PRNGKey(0)
    k1, k2 = jax.random.split(key)
    N, C = 100, 32  # N deliberately not a tile multiple -> exercises padding
    y_pred = jax.random.normal(k1, (N, C), dtype=jnp.float32).astype(jnp.bfloat16)
    y_true = jax.random.randint(k2, (N,), 0, C, dtype=jnp.int32)

    ref = dice_loss_ref(y_pred, y_true)

    # Explicit small tile -> 4 pipelined grid steps (pads 100 -> 128 rows).
    loss = dice_loss(y_pred, y_true, block_n=32)
    jax.block_until_ready(loss)
    assert jnp.allclose(loss, ref, atol=1e-4, rtol=1e-4), (loss, ref)

    # Auto (VMEM-budgeted) tile path.
    loss_auto = dice_loss(y_pred, y_true)
    jax.block_until_ready(loss_auto)
    assert jnp.allclose(loss_auto, ref, atol=1e-4, rtol=1e-4), (loss_auto, ref)

    print("KERNEL_OK")
</pallas_src>

<mosaic_0001>
module attributes {stable_mosaic.version = 11 : i64} {
  func.func @_dice_loss_kernel(%arg0: i32, %arg1: memref<32x32xbf16, #tpu.memory_space<vmem>>, %arg2: memref<32x1xi32, #tpu.memory_space<vmem>>, %arg3: memref<32x1xf32, #tpu.memory_space<vmem>>) attributes {dimension_semantics = [#tpu.dimension_semantics<parallel>], iteration_bounds = array<i64: 4>, scalar_prefetch = 0 : i64, scratch_operands = 0 : i64, tpu.core_type = #tpu.core_type<tc>, window_params = [{transform_indices = @transform_0, window_bounds = array<i64: 32, 32>}, {transform_indices = @transform_1, window_bounds = array<i64: 32, 1>}, {transform_indices = @transform_2, window_bounds = array<i64: 32, 1>}]} {
    %c0 = arith.constant 0 : index
    %c0_0 = arith.constant 0 : index
    %0 = vector.load %arg1[%c0, %c0_0] : memref<32x32xbf16, #tpu.memory_space<vmem>>, vector<32x32xbf16>
    %1 = arith.extf %0 : vector<32x32xbf16> to vector<32x32xf32>
    %cst = arith.constant dense<0xFF800000> : vector<32xf32>
    %2 = vector.multi_reduction <maximumf>, %1, %cst [1] : vector<32x32xf32> to vector<32xf32>
    %3 = vector.shape_cast %2 : vector<32xf32> to vector<32x1xf32>
    %4 = vector.broadcast %3 : vector<32x1xf32> to vector<32x32xf32>
    %5 = arith.subf %1, %4 : vector<32x32xf32>
    %6 = math.exp %5 : vector<32x32xf32>
    %cst_1 = arith.constant dense<0.000000e+00> : vector<32xf32>
    %7 = vector.multi_reduction <add>, %6, %cst_1 [1] : vector<32x32xf32> to vector<32xf32>
    %8 = vector.shape_cast %7 : vector<32xf32> to vector<32x1xf32>
    %c0_2 = arith.constant 0 : index
    %c0_3 = arith.constant 0 : index
    %9 = vector.load %arg2[%c0_2, %c0_3] : memref<32x1xi32, #tpu.memory_space<vmem>>, vector<32x1xi32>
    %10 = tpu.iota {dimensions = array<i32: 1>} : vector<32x32xi32>
    %11 = vector.broadcast %9 : vector<32x1xi32> to vector<32x32xi32>
    %12 = arith.cmpi eq, %10, %11 : vector<32x32xi32>
    %cst_4 = arith.constant 0.000000e+00 : f32
    %13 = vector.broadcast %cst_4 : f32 to vector<32x32xf32>
    %14 = arith.select %12, %6, %13 : vector<32x32xi1>, vector<32x32xf32>
    %cst_5 = arith.constant dense<0.000000e+00> : vector<32xf32>
    %15 = vector.multi_reduction <add>, %14, %cst_5 [1] : vector<32x32xf32> to vector<32xf32>
    %16 = vector.shape_cast %15 : vector<32xf32> to vector<32x1xf32>
    %17 = tpu.reciprocal %8 {approx = true} : vector<32x1xf32> -> vector<32x1xf32>
    %18 = arith.mulf %16, %17 : vector<32x1xf32>
    %cst_6 = arith.constant 1.000000e+00 : f32
    %19 = vector.broadcast %cst_6 : f32 to vector<32x1xf32>
    %20 = arith.subf %19, %18 : vector<32x1xf32>
    %21 = arith.mulf %20, %18 : vector<32x1xf32>
    %cst_7 = arith.constant 1.000000e+00 : f32
    %22 = vector.broadcast %cst_7 : f32 to vector<32x1xf32>
    %23 = arith.addf %21, %22 : vector<32x1xf32>
    %24 = arith.divf %21, %23 : vector<32x1xf32>
    %cst_8 = arith.constant 1.000000e+00 : f32
    %25 = vector.broadcast %cst_8 : f32 to vector<32x1xf32>
    %26 = arith.subf %25, %24 : vector<32x1xf32>
    %c0_9 = arith.constant 0 : index
    %c0_10 = arith.constant 0 : index
    %27 = vector.load %arg3[%c0_9, %c0_10] : memref<32x1xf32, #tpu.memory_space<vmem>>, vector<32x1xf32>
    tpu.vector_store %arg3[%c0_9, %c0_10], %26 {strides = array<i32>} : memref<32x1xf32, #tpu.memory_space<vmem>>, vector<32x1xf32>,
    return
  }
  func.func @transform_0(%arg0: i32) -> (i32, i32) {
    %c0_i32 = arith.constant 0 : i32
    %c0_i32_0 = arith.constant 0 : i32
    return %arg0, %c0_i32 : i32, i32
  }
  func.func @transform_1(%arg0: i32) -> (i32, i32) {
    %c0_i32 = arith.constant 0 : i32
    %c0_i32_0 = arith.constant 0 : i32
    return %arg0, %c0_i32 : i32, i32
  }
  func.func @transform_2(%arg0: i32) -> (i32, i32) {
    %c0_i32 = arith.constant 0 : i32
    %c0_i32_0 = arith.constant 0 : i32
    return %arg0, %c0_i32 : i32, i32
  }
}

</mosaic_0001>

<bundles_post_ra>
// kernel: tpu_custom_call.1
= control target key start
LH: loop header
LB: loop body
LE: loop exit
PB: predicated region body
PF: predicated region fallthrough
CT: control target
= control target key end

     0   :  { %s491_s9 = smov 0   ;;  %s545_s0 = inlined_call_operand.vmem [shape: bf16[128,32], index: 0, kind: input, shape index: {}]   ;;  %s546_s1 = inlined_call_operand.vmem [shape: s32[128,1], index: 1, kind: input, shape index: {}]   ;;  %s547_s2 = inlined_call_operand.vmem [shape: f32[128,1], index: 2, kind: output, shape index: {}]  }
   0x1 LB: > { %s409_s10 = sadd.s32 4294967295, %s473_s9   ;;  %p413_p0 = scmp.ge.s32.totalorder %s473_s9, 1  ;;  %s473_s9 = sphi %s491_s9, %s12_s9  }
   0x2   : > { %p124_p1 = scmp.lt.s32.totalorder %s473_s9, 5 }
   0x4   : > { %p125_p2 = pnand %p413_p0, %p124_p1 }
   0x5   : > { %s414_s11 = sshll.u32 (!%p125_p2), %s409_s10, 2 }
   0x6   : > { %128 = sbr.rel (%p125_p2) target bundleno = 325 (0x145), region = 28  ;;  %p152_p3 = scmp.lt.s32.totalorder (!%p125_p2), %s414_s11, 15 }
   0xb   : > { %v475_v0 = vmov 0   ;;  %s549_s11 = smov (!%p152_p3, %s414_s11), 15  ;;  %vm177_vm0 = vcmask 261120   ;;  %v218_v31 = vlaneseq  ;;  %vm336_vm9 = vcmask 7168  }
   0xc   : > { %441 = vset.pattern.permute.xlu0 %v475_v0  ;;  %442 = vset.pattern.permute.xlu1 %v475_v0  ;;  %s415_s12 = sshll.u32 %s549_s11, 2  ;;  %s417_s16 = sshll.u32 %s549_s11, 3 }
   0xd   : > { %440 = vset.pattern.permute.xlu2 %v475_v0  ;;  %s155_s15 = scalar_lea.vmem %s545_s0, %s415_s12  ;;  %s161_s19 = scalar_lea.vmem %s546_s1, %s417_s16  ;;  %v219_v33 = vand.u32 127, %v218_v31 }
   0xe   : > { %v430_v1 = vld [vmem:[%s155_s15 + $0x8] sm:$0xff]   ;;  %v423_v2 = vld [vmem:[%s155_s15] sm:$0xff]   ;;  %v216_v13 = vld [vmem:[%s161_s19 + $0x10] sm:$0xff]  ;;  %s531_s22 = scalar_lea.vmem %s547_s2, %s417_s16 }
   0xf   : > { %v428_v3 = vunpack.c.l.bf16 %v430_v1  ;;  %v424_v4 = vunpack.c.l.bf16 %v423_v2  ;;  %v429_v7 = vunpack.c.h.bf16 %v430_v1  ;;  %v425_v8 = vunpack.c.h.bf16 %v423_v2  ;;  %v214_v9 = vld [vmem:[%s161_s19] sm:$0xff]  ;;  %v215_v12 = vld [vmem:[%s161_s19 + $0x8] sm:$0xff]  ;;  %v217_v14 = vld [vmem:[%s161_s19 + $0x18] sm:$0xff] }
  0x10   : > { %221 = vperm.xlu2 %440, %v214_v9  }
  0x11   : > { %v184_v5 = vsel %vm177_vm0, %v428_v3, -inf  ;;  %v178_v6 = vsel %vm177_vm0, %v424_v4, -inf  ;;  %v187_v10 = vsel %vm177_vm0, %v429_v7, -inf  ;;  %v181_v11 = vsel %vm177_vm0, %v425_v8, -inf }
  0x12   : > { %185 = vmax.xlane.f32.xlu1 %v184_v5  ;;  %179 = vmax.xlane.f32.xlu0 %v178_v6 }
  0x18   : > { %224 = vperm.xlu2 %440, %v215_v12  }
  0x1a   : > { %188 = vmax.xlane.f32.xlu1 %v187_v10  ;;  %182 = vmax.xlane.f32.xlu0 %v181_v11 }
  0x2e   : > { %227 = vperm.xlu0 %441, %v216_v13  }
  0x33   : > { %230 = vperm.xlu1 %442, %v217_v14  }
  0x6a   : > { %v222_v35 = vpop.permute.xlu2 %221 }
  0x6b   : > { %vm232_vm1 = vcmp.eq.s32.totalorder %v219_v33, %v222_v35 }
  0x72   : > { %v225_v39 = vpop.permute.xlu2 %224 }
  0x73   : > { %vm233_vm2 = vcmp.eq.s32.totalorder %v219_v33, %v225_v39 }
  0x85   : > { %v186_v15 = vpop.xlane.xlu1 %185  ;;  %v180_v16 = vpop.xlane.xlu0 %179 }
  0x86   : > { %v192_v17 = vsub.f32 %v428_v3, %v186_v15  ;;  %v190_v18 = vsub.f32 %v424_v4, %v180_v16 }
  0x88   : > { %v198_v19 = vmul.f32 1.442695, %v192_v17  ;;  %v194_v20 = vmul.f32 1.442695, %v190_v18 }
  0x8a   : > { %443 = vpow2.f32 %v198_v19 }
  0x8b   : > { %445 = vpow2.f32 %v194_v20 }
  0x8d   : > { %v189_v21 = vpop.xlane.xlu1 %188  ;;  %v183_v22 = vpop.xlane.xlu0 %182 }
  0x8e   : > { %v193_v23 = vsub.f32 %v429_v7, %v189_v21  ;;  %v191_v24 = vsub.f32 %v425_v8, %v183_v22 }
  0x90   : > { %v444_v25 = vpop.eup %443  ;;  %v200_v26 = vmul.f32 1.442695, %v193_v23  ;;  %v196_v27 = vmul.f32 1.442695, %v191_v24 }
  0x91   : > { %v446_v28 = vpop.eup %445  ;;  %v208_v29 = vsel %vm177_vm0, %v444_v25, 0.0 }
  0x92   : > { %447 = vpow2.f32 %v200_v26  ;;  %209 = vadd.xlane.f32.xlu0 %v208_v29  ;;  %v202_v30 = vsel %vm177_vm0, %v446_v28, 0.0  ;;  %v236_v38 = vsel %vm232_vm1, %v446_v28, 0.0 }
  0x93   : > { %203 = vadd.xlane.f32.xlu2 %v202_v30  ;;  %449 = vpow2.f32 %v196_v27  ;;  %v240_v40 = vsel %vm177_vm0, %v236_v38, 0.0 }
  0x98   : > { %v448_v32 = vpop.eup %447 }
  0x99   : > { %v450_v34 = vpop.eup %449  ;;  %v211_v36 = vsel %vm177_vm0, %v448_v32, 0.0 }
  0x9a   : > { %v205_v37 = vsel %vm177_vm0, %v450_v34, 0.0  ;;  %v237_v43 = vsel %vm233_vm2, %v450_v34, 0.0 }
  0x9b   : > { %212 = vadd.xlane.f32.xlu2 %v211_v36  ;;  %206 = vadd.xlane.f32.xlu1 %v205_v37  ;;  %v243_v46 = vsel %vm177_vm0, %v237_v43, 0.0 }
  0xa0   : > { %v228_v45 = vpop.permute.xlu0 %227 }
  0xa1   : > { %vm234_vm4 = vcmp.eq.s32.totalorder %v219_v33, %v228_v45 }
  0xa2   : > { %v238_v47 = vsel %vm234_vm4, %v444_v25, 0.0 }
  0xa3   : > { %241 = vadd.xlane.f32.xlu2 %v240_v40  ;;  %v246_v48 = vsel %vm177_vm0, %v238_v47, 0.0 }
  0xa5   : > { %v231_v41 = vpop.permute.xlu1 %230 }
  0xa6   : > { %vm235_vm3 = vcmp.eq.s32.totalorder %v219_v33, %v231_v41 }
  0xa7   : > { %v239_v42 = vsel %vm235_vm3, %v448_v32, 0.0 }
  0xa8   : > { %v249_v44 = vsel %vm177_vm0, %v239_v42, 0.0 }
  0xa9   : > { %250 = vadd.xlane.f32.xlu1 %v249_v44 }
  0xab   : > { %244 = vadd.xlane.f32.xlu2 %v243_v46 }
  0xb3   : > { %247 = vadd.xlane.f32.xlu2 %v246_v48 }
 0x105   : > { %v210_v60 = vpop.xlane.xlu0 %209 }
 0x106   : > { %v204_v49 = vpop.xlane.xlu2 %203 }
 0x107   : > { %451 = vrcp.f32 %v204_v49 }
 0x10d   : > { %v452_v52 = vpop.eup %451 }
 0x10e   : > { %v213_v50 = vpop.xlane.xlu2 %212  ;;  %v207_v51 = vpop.xlane.xlu1 %206 }
 0x10f   : > { %453 = vrcp.f32 %v213_v50 }
 0x110   : > { %455 = vrcp.f32 %v207_v51 }
 0x115   : > { %v454_v57 = vpop.eup %453 }
 0x116   : > { %v242_v53 = vpop.xlane.xlu2 %241  ;;  %v456_v59 = vpop.eup %455 }
 0x117   : > { %v256_v54 = vmul.f32 %v452_v52, %v242_v53 }
 0x119   : > { %v260_v55 = vsub.f32 1.0, %v256_v54 }
 0x11b   : > { %v264_v56 = vmul.f32 %v260_v55, %v256_v54 }
 0x11c   : > { %v251_v58 = vpop.xlane.xlu1 %250 }
 0x11d   : > { %v268_v61 = vadd.f32 1.0, %v264_v56  ;;  %v259_v62 = vmul.f32 %v454_v57, %v251_v58 }
 0x11e   : > { %v245_v63 = vpop.xlane.xlu2 %244 }
 0x11f   : > { %457 = vrcp.f32 %v268_v61  ;;  %v263_v0 = vsub.f32 1.0, %v259_v62  ;;  %v257_v1 = vmul.f32 %v456_v59, %v245_v63  ;;  %v283_v13 = vand.u32 2147483648, %v268_v61 }
 0x120   : > { %459 = vrcp.f32 %v210_v60  ;;  %v281_v15 = vand.u32 2147483647, %v268_v61  ;;  %vm277_vm6 = vweird.f32 %v268_v61 }
 0x121   : > { %v267_v2 = vmul.f32 %v263_v0, %v259_v62  ;;  %v261_v3 = vsub.f32 1.0, %v257_v1  ;;  %v284_v20 = vor.u32 1.1754944e-38, %v283_v13 }
 0x122   : > { %vm282_vm8 = vcmp.eq.f32.partialorder %v281_v15, 8.507059e+37 }
 0x123   : > { %v271_v4 = vadd.f32 1.0, %v267_v2  ;;  %v523_v5 = vmul.f32 %v261_v3, %v257_v1 }
 0x125   : > { %v458_v6 = vpop.eup %457  ;;  %461 = vrcp.f32 %v271_v4  ;;  %v269_v10 = vadd.f32 1.0, %v523_v5  ;;  %v328_v28 = vand.u32 2147483648, %v271_v4  ;;  %v326_v31 = vand.u32 2147483647, %v271_v4 }
 0x126   : > { %v460_v7 = vpop.eup %459  ;;  %v273_v8 = vmul.f32 %v458_v6, %v268_v61  ;;  %v248_v9 = vpop.xlane.xlu2 %247  ;;  %vm278_vm5 = vweird.f32 %v458_v6  ;;  %vm322_vm11 = vweird.f32 %v271_v4 }
 0x127   : > { %v258_v11 = vmul.f32 %v460_v7, %v248_v9  ;;  %463 = vrcp.f32 %v269_v10  ;;  %vm279_vm7 = vmor %vm277_vm6, %vm278_vm5  ;;  %v298_v35 = vand.u32 2147483648, %v269_v10  ;;  %v329_v36 = vor.u32 1.1754944e-38, %v328_v28 }
 0x128   : > { %v274_v12 = vsub.f32 1.0, %v273_v8  ;;  %v296_v38 = vand.u32 2147483647, %v269_v10  ;;  %vm327_vm14 = vcmp.eq.f32.partialorder %v326_v31, 8.507059e+37  ;;  %vm292_vm15 = vweird.f32 %v269_v10 }
 0x129   : > { %v262_v16 = vsub.f32 1.0, %v258_v11  ;;  %v299_v44 = vor.u32 1.1754944e-38, %v298_v35 }
 0x12a   : > { %v275_v14 = vmul.f32 %v458_v6, %v274_v12  ;;  %vm297_vm1 = vcmp.eq.f32.partialorder %v296_v38, 8.507059e+37 }
 0x12b   : > { %v462_v17 = vpop.eup %461  ;;  %v266_v19 = vmul.f32 %v262_v16, %v258_v11 }
 0x12c   : > { %v276_v18 = vadd.f32 %v458_v6, %v275_v14  ;;  %v318_v21 = vmul.f32 %v462_v17, %v271_v4  ;;  %vm323_vm10 = vweird.f32 %v462_v17 }
 0x12d   : > { %v270_v23 = vadd.f32 1.0, %v266_v19  ;;  %v464_v24 = vpop.eup %463  ;;  %vm324_vm12 = vmor %vm322_vm11, %vm323_vm10 }
 0x12e   : > { %v280_v22 = vsel %vm279_vm7, %v458_v6, %v276_v18  ;;  %v319_v26 = vsub.f32 1.0, %v318_v21  ;;  %v288_v29 = vmul.f32 %v464_v24, %v269_v10  ;;  %vm293_vm13 = vweird.f32 %v464_v24 }
 0x12f   : > { %v285_v25 = vsel %vm282_vm8, %v284_v20, %v280_v22  ;;  %465 = vrcp.f32 %v270_v23  ;;  %vm294_vm0 = vmor %vm292_vm15, %vm293_vm13  ;;  %v313_v51 = vand.u32 2147483648, %v270_v23  ;;  %v311_v53 = vand.u32 2147483647, %v270_v23 }
 0x130   : > { %v286_v27 = vmul.f32 %v285_v25, %v264_v56  ;;  %v320_v30 = vmul.f32 %v462_v17, %v319_v26  ;;  %v289_v33 = vsub.f32 1.0, %v288_v29  ;;  %vm307_vm3 = vweird.f32 %v270_v23 }
 0x131   : > { %v314_v56 = vor.u32 1.1754944e-38, %v313_v51  ;;  %vm312_vm5 = vcmp.eq.f32.partialorder %v311_v53, 8.507059e+37 }
 0x132   : > { %v332_v32 = vsub.f32 1.0, %v286_v27  ;;  %v321_v34 = vadd.f32 %v462_v17, %v320_v30  ;;  %v290_v37 = vmul.f32 %v464_v24, %v289_v33 }
 0x134   : > { %337 = vst.msk [vmem:[%s531_s22] sm:$0xff] %vm336_vm9, %v332_v32  ;;  %v325_v39 = vsel %vm324_vm12, %v462_v17, %v321_v34  ;;  %v291_v42 = vadd.f32 %v464_v24, %v290_v37 }
 0x135   : > { %v466_v40 = vpop.eup %465  ;;  %v330_v41 = vsel %vm327_vm14, %v329_v36, %v325_v39 }
 0x136   : > { %v331_v43 = vmul.f32 %v330_v41, %v267_v2  ;;  %v303_v45 = vmul.f32 %v466_v40, %v270_v23  ;;  %v295_v46 = vsel %vm294_vm0, %v464_v24, %v291_v42  ;;  %vm308_vm2 = vweird.f32 %v466_v40 }
 0x137   : > { %v300_v48 = vsel %vm297_vm1, %v299_v44, %v295_v46  ;;  %vm309_vm4 = vmor %vm307_vm3, %vm308_vm2 }
 0x138   : > { %v335_v47 = vsub.f32 1.0, %v331_v43  ;;  %v304_v49 = vsub.f32 1.0, %v303_v45  ;;  %v301_v50 = vmul.f32 %v300_v48, %v523_v5 }
 0x13a   : > { %340 = vst.msk [vmem:[%s531_s22 + $0x18] sm:$0xff] %vm336_vm9, %v335_v47  ;;  %v305_v52 = vmul.f32 %v466_v40, %v304_v49  ;;  %v333_v54 = vsub.f32 1.0, %v301_v50 }
 0x13c   : > { %v306_v55 = vadd.f32 %v466_v40, %v305_v52  ;;  %338 = vst.msk [vmem:[%s531_s22 + $0x8] sm:$0xff] %vm336_vm9, %v333_v54 }
 0x13e   : > { %v310_v57 = vsel %vm309_vm4, %v466_v40, %v306_v55 }
 0x13f   : > { %v315_v58 = vsel %vm312_vm5, %v314_v56, %v310_v57 }
 0x140   : > { %v316_v59 = vmul.f32 %v315_v58, %v266_v19 }
 0x142   : > { %v334_v60 = vsub.f32 1.0, %v316_v59 }
 0x144   : > { %339 = vst.msk [vmem:[%s531_s22 + $0x10] sm:$0xff] %vm336_vm9, %v334_v60 }
 0x145 PF: > { %s12_s9 = sadd.s32 1, %s473_s9  }
 0x146   : > { %p9_p4 = scmp.ge.s32.totalorder %s12_s9, 6  }
 0x148   :  { %11 = sbr.rel (!%p9_p4) target bundleno = 1 (0x1), region = 61 }

</bundles_post_ra>
